<compile_context>
chip_gen: v7x
topology: tpu7x:2x2x1
jax: 0.10.0
libtpu: 0.0.40
codegen_flags: <defaults>
</compile_context>

<pallas_src>
import jax
import jax.numpy as jnp
from jax.experimental import pallas as pl
from jax.experimental.pallas import tpu as pltpu

OUT_CHANNELS = 32
KH, KW = 3, 3
LEAK = 0.2


def _auto_grid_blocks(n):
    """One parallel grid step per TensorCore that can get work."""
    try:
        kind = jax.devices()[0].device_kind.lower()
    except Exception:
        return 1
    n_cores = 2 if "7" in kind else 1   # v7x: 2 TCs/chip; v5e/v6e: 1 TC
    return n_cores if n >= n_cores else 1


def random_cnn_forward(x, weight, bias=None, *, grid_blocks=None):
    """x: (N, 1, H, W) NCHW like PyTorch.  Returns NCHW (N, 32, H-2, W-2).

    `bias` is accepted for signature parity only: RandomCNN freezes bias to
    zero, so the kernel omits the bias add entirely (perf review).
    """
    del bias  # RandomCNN pins bias to exactly zero.
    N, C, H, W = x.shape
    assert C == 1, "RandomCNN conv1 expects a single input channel"
    assert H >= KH and W >= KW, "spatial dims must be >= 3"
    Ho, Wo = H - KH + 1, W - KW + 1
    HW = H * W
    # Lane-dense flat spatial extent (multiple of 128 -> unmasked stores).
    L = ((HW + 127) // 128) * 128

    itemsize = jnp.dtype(x.dtype).itemsize
    compute_dtype = jnp.bfloat16 if x.dtype == jnp.bfloat16 else jnp.float32
    c_itemsize = jnp.dtype(compute_dtype).itemsize

    # Per-image VMEM footprint of a grid step: double-buffered in/out blocks
    # plus in-kernel rolled rows / patches / f32 accumulator.
    per_img = (2 * L * itemsize                       # input block  x2 buffers
               + 2 * OUT_CHANNELS * L * itemsize      # output block x2 buffers
               + 2 * KH * KW * L * itemsize           # 9 rolled rows + patches
               + OUT_CHANNELS * L * 4)                # f32 accumulator
    # Cap images per step: <=8 keeps the block-diagonal weight tiny / the MXU
    # zero-padding negligible, and the VMEM budget stays well under 32 MiB
    # (safe for v7x's 64 MiB physical VMEM with double-buffering).
    b_cap = max(1, min(8, (24 << 20) // per_img))

    if grid_blocks is None:
        G = _auto_grid_blocks(N)
    else:
        G = max(1, min(int(grid_blocks), N))
    G = max(G, -(-N // b_cap))        # more steps if a block would bust VMEM
    G = min(G, N)
    B_blk = -(-N // G)                # images per grid step
    N_pad = G * B_blk

    # ---- wrapper-side layout (input is 32x smaller than the output) --------
    x_flat = x.reshape(N, HW)
    if N_pad != N or L != HW:
        x_flat = jnp.pad(x_flat, ((0, N_pad - N), (0, L - HW)))
    x3 = x_flat.reshape(G, B_blk, L)  # batch on sublanes, flat spatial on lanes

    # Block-diagonal weights: W_big[b*32+o, k*B_blk+b'] = w[o,k] * (b==b'),
    # so the whole block is ONE matmul  W_big @ patches -> (B_blk*32, L).
    w9 = weight.reshape(OUT_CHANNELS, KH * KW).astype(compute_dtype)
    eye = jnp.eye(B_blk, dtype=compute_dtype)
    w_big = jnp.einsum("ok,bc->bokc", w9, eye).reshape(
        B_blk * OUT_CHANNELS, KH * KW * B_blk)

    tap_offsets = tuple(ki * W + kj for ki in range(KH) for kj in range(KW))

    def kernel(x_ref, w_ref, o_ref):
        # x_ref: (1, B_blk, L)   w_ref: (B_blk*32, B_blk*9)   o_ref: (B_blk*32, L)
        xb = x_ref[0]                                       # (B_blk, L)
        # One lane rotation (XLU) per conv tap for the whole block; wrap-around
        # only touches junk columns that the wrapper slices off.
        rows = [xb if off == 0 else pltpu.roll(xb, shift=L - off, axis=1)
                for off in tap_offsets]
        patches = jnp.concatenate(rows, axis=0)             # (9*B_blk, L)
        acc = jnp.dot(w_ref[...], patches.astype(w_ref.dtype),
                      preferred_element_type=jnp.float32)   # single MXU matmul
        acc = jnp.maximum(acc, LEAK * acc)                  # LeakyReLU(0.2)
        o_ref[...] = acc.astype(o_ref.dtype)                # lane-dense store

    w_big_bytes = (B_blk * OUT_CHANNELS) * (B_blk * KH * KW) * c_itemsize
    vmem_need = B_blk * per_img + 2 * w_big_bytes
    vmem_limit = int(min(max(4 * vmem_need, 8 << 20), 32 << 20))

    res = pl.pallas_call(
        kernel,
        out_shape=jax.ShapeDtypeStruct((N_pad * OUT_CHANNELS, L), x.dtype),
        grid_spec=pltpu.PrefetchScalarGridSpec(
            num_scalar_prefetch=0,
            grid=(G,),
            in_specs=[
                pl.BlockSpec((1, B_blk, L), lambda g: (g, 0, 0)),
                pl.BlockSpec((B_blk * OUT_CHANNELS, KH * KW * B_blk),
                             lambda g: (0, 0)),
            ],
            out_specs=pl.BlockSpec((B_blk * OUT_CHANNELS, L), lambda g: (g, 0)),
        ),
        compiler_params=pltpu.CompilerParams(
            dimension_semantics=("parallel",),
            vmem_limit_bytes=vmem_limit),
    )(x3, w_big)

    # Pure layout plumbing: free reshapes plus one fused slice back to NCHW.
    res = res.reshape(N_pad, OUT_CHANNELS, L)[:N, :, :HW]
    return res.reshape(N, OUT_CHANNELS, H, W)[:, :, :Ho, :Wo]


if __name__ == "__main__":
    key = jax.random.PRNGKey(0)
    k_x, k_w = jax.random.split(key)

    N, C, H, W = 2, 1, 16, 16
    x = jax.random.normal(k_x, (N, C, H, W), dtype=jnp.float32)

    # Deterministic init mirroring the module: weight = randn(32,1,3,3), bias = 0.
    weight = jax.random.normal(k_w, (OUT_CHANNELS, 1, KH, KW), dtype=jnp.float32)
    bias = jnp.zeros((OUT_CHANNELS,), dtype=jnp.float32)

    # Reference: XLA conv (NCHW, valid) + LeakyReLU(0.2).
    ref = jax.lax.conv_general_dilated(
        x, weight, window_strides=(1, 1), padding="VALID",
        dimension_numbers=("NCHW", "OIHW", "NCHW"))
    ref = jnp.where(ref > 0, ref, LEAK * ref)

    out_auto = jax.block_until_ready(random_cnn_forward(x, weight, bias))
    out_g1 = jax.block_until_ready(random_cnn_forward(x, weight, bias, grid_blocks=1))
    out_g2 = jax.block_until_ready(random_cnn_forward(x, weight, bias, grid_blocks=2))

    for out in (out_auto, out_g1, out_g2):
        assert out.shape == (N, OUT_CHANNELS, H - 2, W - 2)
        assert jnp.allclose(out, ref, atol=1e-4, rtol=1e-4)

    print("KERNEL_OK")
</pallas_src>

<mosaic_0001>
module attributes {stable_mosaic.version = 11 : i64} {
  func.func @kernel(%arg0: i32, %arg1: memref<1x2x256xf32, #tpu.memory_space<vmem>>, %arg2: memref<64x18xf32, #tpu.memory_space<vmem>>, %arg3: memref<64x256xf32, #tpu.memory_space<vmem>>) attributes {dimension_semantics = [#tpu.dimension_semantics<parallel>], iteration_bounds = array<i64: 1>, scalar_prefetch = 0 : i64, scratch_operands = 0 : i64, tpu.core_type = #tpu.core_type<tc>, window_params = [{transform_indices = @transform_0, window_bounds = array<i64: 1, 2, 256>}, {pipeline_mode = #tpu.pipeline_mode<synchronous>, transform_indices = @transform_1, window_bounds = array<i64: 64, 18>}, {transform_indices = @transform_2, window_bounds = array<i64: 64, 256>}]} {
    %c0 = arith.constant 0 : index
    %c0_0 = arith.constant 0 : index
    %c0_1 = arith.constant 0 : index
    %0 = vector.load %arg1[%c0, %c0_0, %c0_1] : memref<1x2x256xf32, #tpu.memory_space<vmem>>, vector<1x2x256xf32>
    %1 = vector.shape_cast %0 : vector<1x2x256xf32> to vector<2x256xf32>
    %c255_i32 = arith.constant 255 : i32
    %2 = tpu.dynamic_rotate %1 by %c255_i32 dim 1 : vector<2x256xf32>, i32 -> vector<2x256xf32>
    %c254_i32 = arith.constant 254 : i32
    %3 = tpu.dynamic_rotate %1 by %c254_i32 dim 1 : vector<2x256xf32>, i32 -> vector<2x256xf32>
    %c240_i32 = arith.constant 240 : i32
    %4 = tpu.dynamic_rotate %1 by %c240_i32 dim 1 : vector<2x256xf32>, i32 -> vector<2x256xf32>
    %c239_i32 = arith.constant 239 : i32
    %5 = tpu.dynamic_rotate %1 by %c239_i32 dim 1 : vector<2x256xf32>, i32 -> vector<2x256xf32>
    %c238_i32 = arith.constant 238 : i32
    %6 = tpu.dynamic_rotate %1 by %c238_i32 dim 1 : vector<2x256xf32>, i32 -> vector<2x256xf32>
    %c224_i32 = arith.constant 224 : i32
    %7 = tpu.dynamic_rotate %1 by %c224_i32 dim 1 : vector<2x256xf32>, i32 -> vector<2x256xf32>
    %c223_i32 = arith.constant 223 : i32
    %8 = tpu.dynamic_rotate %1 by %c223_i32 dim 1 : vector<2x256xf32>, i32 -> vector<2x256xf32>
    %c222_i32 = arith.constant 222 : i32
    %9 = tpu.dynamic_rotate %1 by %c222_i32 dim 1 : vector<2x256xf32>, i32 -> vector<2x256xf32>
    %10 = tpu.concatenate %1, %2, %3, %4, %5, %6, %7, %8, %9 in 0 : vector<2x256xf32>, vector<2x256xf32>, vector<2x256xf32>, vector<2x256xf32>, vector<2x256xf32>, vector<2x256xf32>, vector<2x256xf32>, vector<2x256xf32>, vector<2x256xf32> -> vector<18x256xf32>
    %c0_2 = arith.constant 0 : index
    %c0_3 = arith.constant 0 : index
    %11 = vector.load %arg2[%c0_2, %c0_3] : memref<64x18xf32, #tpu.memory_space<vmem>>, vector<64x18xf32>
    %cst = arith.constant dense<0.000000e+00> : vector<64x256xf32>
    %12 = tpu.matmul %11, %10, %cst {dimension_numbers = #tpu.dot_dimension_numbers<[1], [0], [0], [1], [0, 0, 1, 1], [], []>} : vector<64x18xf32>, vector<18x256xf32>, vector<64x256xf32> -> vector<64x256xf32>
    %cst_4 = arith.constant 2.000000e-01 : f32
    %13 = vector.broadcast %cst_4 : f32 to vector<64x256xf32>
    %14 = arith.mulf %13, %12 : vector<64x256xf32>
    %15 = arith.maximumf %12, %14 : vector<64x256xf32>
    %c0_5 = arith.constant 0 : index
    %c0_6 = arith.constant 0 : index
    %16 = vector.load %arg3[%c0_5, %c0_6] : memref<64x256xf32, #tpu.memory_space<vmem>>, vector<64x256xf32>
    tpu.vector_store %arg3[%c0_5, %c0_6], %15 {strides = array<i32>} : memref<64x256xf32, #tpu.memory_space<vmem>>, vector<64x256xf32>,
    return
  }
  func.func @transform_0(%arg0: i32) -> (i32, i32, i32) {
    %c0_i32 = arith.constant 0 : i32
    %c0_i32_0 = arith.constant 0 : i32
    %c0_i32_1 = arith.constant 0 : i32
    return %arg0, %c0_i32, %c0_i32_0 : i32, i32, i32
  }
  func.func @transform_1(%arg0: i32) -> (i32, i32) {
    %c0_i32 = arith.constant 0 : i32
    %c0_i32_0 = arith.constant 0 : i32
    %c0_i32_1 = arith.constant 0 : i32
    return %c0_i32, %c0_i32_0 : i32, i32
  }
  func.func @transform_2(%arg0: i32) -> (i32, i32) {
    %c0_i32 = arith.constant 0 : i32
    %c0_i32_0 = arith.constant 0 : i32
    return %arg0, %c0_i32 : i32, i32
  }
}

</mosaic_0001>

<bundles_post_ra>
// kernel: tpu_custom_call.1
= control target key start
LH: loop header
LB: loop body
LE: loop exit
PB: predicated region body
PF: predicated region fallthrough
CT: control target
= control target key end

     0   :  { %s579_s0 = inlined_call_operand.vmem [shape: f32[1,2,256], index: 0, kind: input, shape index: {}]   ;;  %s580_s1 = inlined_call_operand.vmem [shape: f32[64,18], index: 1, kind: input, shape index: {}]   ;;  %s581_s2 = inlined_call_operand.hbm [shape: f32[64,256], index: 2, kind: output, shape index: {}]  }
   0x1   :  { %v469_v0 = vld.sshfl [vmem:[%s579_s0] sm:$0x33 pattern:$0x76325410] }
   0x2   :  { %v473_v1 = vcombine.high %v469_v0, %v469_v0 }
   0x3   :  { %7 = vsyncpa [#allocation3], 0  ;;  %s439_s11 = smov 126   ;;  %s440_s12 = smov 127   ;;  %v447_v3 = vmov 0.0   ;;  %v28_v4 = vlaneseq  ;;  %vm118_vm3 = vcmask 1041408  }
   0x4   :  { %v390_v2 = vpack.i.bf16 %v473_v1, %v469_v0  ;;  %s441_s13 = smov 96   ;;  %s442_s14 = smov 110   ;;  %236 = vmatprep.mubr.f32.mxu0 %v447_v3  ;;  %260 = vmatprep.mubr.f32.mxu1 %v447_v3  ;;  %vm121_vm6 = vcmask 1043456   ;;  %vm124_vm9 = vcmask 1045504   ;;  %vm141_vm11 = vcmask 146432  }
   0x5   :  { %s443_s15 = smov 111   ;;  %s444_s0 = smov 112   ;;  %v481_v5 = vand.u32 127, %v28_v4 }
   0x6   :  { %391 = vrot.lane.b32.xlu1 %v390_v2, %s439_s11  ;;  %381 = vrot.lane.b32.xlu0 %v390_v2, %s440_s12  ;;  %s445_s16 = smov 95   ;;  %s446_s17 = smov 94  }
   0x7   :  { %vm30_vm0 = vcmp.lt.s32.totalorder %v481_v5, 127  ;;  %vm37_vm1 = vcmp.lt.s32.totalorder %v481_v5, 126  ;;  %vm58_vm2 = vcmp.lt.s32.totalorder %v481_v5, 110  ;;  %vm65_vm4 = vcmp.lt.s32.totalorder %v481_v5, 96 }
   0x8   :  { %vm51_vm5 = vcmp.lt.s32.totalorder %v481_v5, 111  ;;  %vm44_vm7 = vcmp.lt.s32.totalorder %v481_v5, 112  ;;  %vm72_vm8 = vcmp.lt.s32.totalorder %v481_v5, 95  ;;  %vm79_vm10 = vcmp.lt.s32.totalorder %v481_v5, 94  ;;  %v134_v5 = vld [vmem:[%s580_s1 + $0x8] sm:$0xff] }
   0xa   :  { %396 = vrot.lane.b32.xlu1 %v390_v2, %s441_s13  ;;  %386 = vrot.lane.b32.xlu0 %v390_v2, %s442_s14 }
   0xe   :  { %406 = vrot.lane.b32.xlu1 %v390_v2, %s443_s15  ;;  %401 = vrot.lane.b32.xlu0 %v390_v2, %s444_s0 }
  0x12   :  { %411 = vrot.lane.b32.xlu0 %v390_v2, %s445_s16  ;;  %75 = vrot.lane.b32.xlu1 %v469_v0, %s446_s17 }
  0x16   :  { %77 = vrot.lane.b32.xlu0 %v473_v1, %s446_s17 }
  0x78   :  { %v392_v6 = vpop.permute.xlu1 %391  ;;  %v382_v7 = vpop.permute.xlu0 %381 }
  0x79   :  { %v384_v8 = vunpack.i.h.bf16 %v382_v7  ;;  %v383_v9 = vunpack.i.l.bf16 %v382_v7  ;;  %v394_v10 = vunpack.i.h.bf16 %v392_v6  ;;  %v393_v11 = vunpack.i.l.bf16 %v392_v6 }
  0x7b   :  { %v31_v14 = vsel %vm30_vm0, %v383_v9, %v384_v8  ;;  %v32_v15 = vsel %vm30_vm0, %v384_v8, %v383_v9  ;;  %v38_v20 = vsel %vm37_vm1, %v393_v11, %v394_v10  ;;  %v39_v21 = vsel %vm37_vm1, %v394_v10, %v393_v11  ;;  %v133_v9 = vld [vmem:[%s580_s1] sm:$0xff]  ;;  %v138_v11 = vld [vmem:[%s580_s1 + $0x28] sm:$0xff] }
  0x7c   :  { %v397_v12 = vpop.permute.xlu1 %396  ;;  %v387_v13 = vpop.permute.xlu0 %386  ;;  %v84_v22 = vrot.slane %v31_v14, 6  ;;  %v85_v23 = vrot.slane %v32_v15, 6  ;;  %v90_v32 = vrot.slane %v38_v20, 4  ;;  %v91_v33 = vrot.slane %v39_v21, 4  ;;  %v137_v10 = vld [vmem:[%s580_s1 + $0x20] sm:$0xff]  ;;  %v136_v14 = vld [vmem:[%s580_s1 + $0x18] sm:$0xff] }
  0x7d   :  { %v389_v16 = vunpack.i.h.bf16 %v387_v13  ;;  %v388_v17 = vunpack.i.l.bf16 %v387_v13  ;;  %v399_v18 = vunpack.i.h.bf16 %v397_v12  ;;  %v398_v19 = vunpack.i.l.bf16 %v397_v12  ;;  %v135_v12 = vld [vmem:[%s580_s1 + $0x10] sm:$0xff]  ;;  %v140_v15 = vld [vmem:[%s580_s1 + $0x38] sm:$0xff] }
  0x7e   :  { %v120_v43 = vsel %vm118_vm3, %v473_v1, %v85_v23  ;;  %v119_v44 = vsel %vm118_vm3, %v469_v0, %v84_v22  ;;  %v139_v13 = vld [vmem:[%s580_s1 + $0x30] sm:$0xff]  ;;  %s448_s1 = smov [#allocation2]  }
  0x7f   :  { %v59_v24 = vsel %vm58_vm2, %v388_v17, %v389_v16  ;;  %v60_v25 = vsel %vm58_vm2, %v389_v16, %v388_v17  ;;  %v66_v34 = vsel %vm65_vm4, %v398_v19, %v399_v18  ;;  %v67_v35 = vsel %vm65_vm4, %v399_v18, %v398_v19  ;;  %s338_s6 = sshll.u32 %s448_s1, 4  ;;  %s339_s6 = int_to_ptr.vmem [resolvable:$true] %s338_s6 }
  0x80   :  { %v407_v26 = vpop.permute.xlu1 %406  ;;  %v402_v27 = vpop.permute.xlu0 %401  ;;  %v102_v40 = vrot.slane %v59_v24, 6  ;;  %v103_v41 = vrot.slane %v60_v25, 6  ;;  %v108_v45 = vrot.slane %v66_v34, 4  ;;  %v109_v46 = vrot.slane %v67_v35, 4  ;;  %s415_s7 = scalar_lea.vmem %s339_s6, 2048  ;;  %p420_p1 = scmp.lt.s32.totalorder %s339_s6, %s339_s6 }
  0x81   :  { %v409_v28 = vunpack.i.h.bf16 %v407_v26  ;;  %v408_v29 = vunpack.i.l.bf16 %v407_v26  ;;  %v404_v30 = vunpack.i.h.bf16 %v402_v27  ;;  %v403_v31 = vunpack.i.l.bf16 %v402_v27  ;;  %p416_p0 = scmp.ne.s32.totalorder %s339_s6, %s415_s7  ;;  %p421_p2 = scmp.lt.s32.totalorder %s415_s7, %s415_s7 }
  0x82   :  { %v123_v57 = vsel %vm121_vm6, %v120_v43, %v91_v33  ;;  %v122_v59 = vsel %vm121_vm6, %v119_v44, %v90_v32 }
  0x83   :  { %v52_v36 = vsel %vm51_vm5, %v408_v29, %v409_v28  ;;  %v53_v37 = vsel %vm51_vm5, %v409_v28, %v408_v29  ;;  %v45_v38 = vsel %vm44_vm7, %v403_v31, %v404_v30  ;;  %v46_v39 = vsel %vm44_vm7, %v404_v30, %v403_v31  ;;  %p422_p3 = por %p421_p2, %p420_p1 }
  0x84   :  { %v412_v42 = vpop.permute.xlu0 %411  ;;  %v96_v49 = vrot.slane %v45_v38, 2  ;;  %v97_v50 = vrot.slane %v46_v39, 2  ;;  %v128_v51 = vsel %vm118_vm3, %v53_v37, %v103_v41  ;;  %v127_v52 = vsel %vm118_vm3, %v52_v36, %v102_v40  ;;  %v76_v61 = vpop.permute.xlu1 %75 }
  0x85   :  { %v414_v47 = vunpack.i.h.bf16 %v412_v42  ;;  %v413_v48 = vunpack.i.l.bf16 %v412_v42  ;;  %v130_v58 = vsel %vm121_vm6, %v128_v51, %v109_v46  ;;  %v129_v60 = vsel %vm121_vm6, %v127_v52, %v108_v45  ;;  %p423_p4 = pnand %p422_p3, %p416_p0 }
  0x86   :  { %v126_v63 = vsel %vm124_vm9, %v123_v57, %v97_v50  ;;  %v125_v1 = vsel %vm124_vm9, %v122_v59, %v96_v49 }
  0x87   :  { %v73_v53 = vsel %vm72_vm8, %v413_v48, %v414_v47  ;;  %v74_v54 = vsel %vm72_vm8, %v414_v47, %v413_v48 }
  0x88   :  { %v114_v55 = vrot.slane %v73_v53, 2  ;;  %v115_v56 = vrot.slane %v74_v54, 2  ;;  %v78_v62 = vpop.permute.xlu0 %77 }
  0x89   :  { %v81_v7 = vsel %vm79_vm10, %v78_v62, %v76_v61  ;;  %v80_v8 = vsel %vm79_vm10, %v76_v61, %v78_v62 }
  0x8a   :  { %v132_v0 = vsel %vm124_vm9, %v130_v58, %v115_v56  ;;  %v131_v2 = vsel %vm124_vm9, %v129_v60, %v114_v55 }
  0x8b   :  { %v360_v4 = vpack.c.bf16 %v132_v0, %v126_v63  ;;  %v362_v6 = vpack.c.bf16 %v131_v2, %v125_v1 }
  0x8d   :  { %361 = vmatprep.subr.bf16.mxu0 %v360_v4  ;;  %364 = vmatprep.subr.bf16.mxu1 %v360_v4 }
  0x8e   :  { %363 = vmatpush1.bf16.msra.mxu0 %v362_v6  ;;  %366 = vmatpush1.bf16.msra.mxu1 %v362_v6 }
  0x8f   :  { %350 = vmatprep.subr.msk.mxu0 %vm118_vm3, %v81_v7  ;;  %365 = vmatprep.subr.msk.mxu1 %vm118_vm3, %v81_v7 }
  0x92   :  { %351 = vmatpush1.msk.msra.mxu0 %vm118_vm3, %v80_v8  ;;  %367 = vmatpush1.msk.msra.mxu1 %vm118_vm3, %v80_v8 }
  0x93   :  { %352 = vmatmul.mubr.msk.f32.vlgmr.msra.gmra.mrb[0].mxu0 %vm141_vm11, %v133_v9  ;;  %356 = vmatmul.mubr.msk.f32.vlgmr.msra.gmra.mrb[0].mxu1 %vm141_vm11, %v137_v10 }
  0x94   :  { %242 = vmatprep.mubr.f32.mxu0 %v447_v3  ;;  %266 = vmatprep.mubr.f32.mxu1 %v447_v3 }
  0x97   :  { %353 = vmatmul.mubr.msk.f32.gmra.mrb[2].mxu0 %vm141_vm11, %v134_v5  ;;  %357 = vmatmul.mubr.msk.f32.gmra.mrb[2].mxu1 %vm141_vm11, %v138_v11 }
  0x98   :  { %248 = vmatprep.mubr.f32.mxu0 %v447_v3  ;;  %272 = vmatprep.mubr.f32.mxu1 %v447_v3 }
  0x9b   :  { %354 = vmatmul.mubr.msk.f32.gmra.mrb[4].mxu0 %vm141_vm11, %v135_v12  ;;  %358 = vmatmul.mubr.msk.f32.gmra.mrb[4].mxu1 %vm141_vm11, %v139_v13 }
  0x9c   :  { %254 = vmatprep.mubr.f32.mxu0 %v447_v3  ;;  %278 = vmatprep.mubr.f32.mxu1 %v447_v3 }
  0x9f   :  { %355 = vmatmul.mubr.msk.f32.gmra.mrb[6].mxu0 %vm141_vm11, %v136_v14  ;;  %359 = vmatmul.mubr.msk.f32.gmra.mrb[6].mxu1 %vm141_vm11, %v140_v15 }
 0x166   :  { %v238_v16 = vpop.f32.mrb[0].mxu0  ;;  %v262_v17 = vpop.f32.mrb[0].mxu1 }
 0x167   :  { %v285_v18 = vmul.f32 0.2, %v238_v16  ;;  %v293_v19 = vmul.f32 0.2, %v262_v17  ;;  %v240_v20 = vpop.f32.mrb[1].mxu0  ;;  %v264_v21 = vpop.f32.mrb[1].mxu1 }
 0x168   :  { %v286_v22 = vmul.f32 0.2, %v240_v20  ;;  %v294_v3 = vmul.f32 0.2, %v264_v21 }
 0x169   :  { %v301_v23 = vmax.f32 %v238_v16, %v285_v18  ;;  %v309_v24 = vmax.f32 %v262_v17, %v293_v19 }
 0x16a   :  { %v302_v25 = vmax.f32 %v240_v20, %v286_v22  ;;  %v310_v26 = vmax.f32 %v264_v21, %v294_v3  ;;  %v244_v27 = vpop.f32.mrb[2].mxu0  ;;  %v268_v28 = vpop.f32.mrb[2].mxu1 }
 0x16b   :  { %317 = vst [vmem:[#allocation2] sm:$0xff] %v301_v23  ;;  %325 = vst [vmem:[#allocation2 + $0x40] sm:$0xff] %v309_v24  ;;  %v287_v29 = vmul.f32 0.2, %v244_v27  ;;  %v295_v30 = vmul.f32 0.2, %v268_v28 }
 0x16c   :  { %v246_v31 = vpop.f32.mrb[3].mxu0  ;;  %v270_v32 = vpop.f32.mrb[3].mxu1  ;;  %318 = vst [vmem:[#allocation2 + $0x8] sm:$0xff] %v302_v25  ;;  %326 = vst [vmem:[#allocation2 + $0x48] sm:$0xff] %v310_v26 }
 0x16d   :  { %v288_v33 = vmul.f32 0.2, %v246_v31  ;;  %v296_v34 = vmul.f32 0.2, %v270_v32  ;;  %v303_v35 = vmax.f32 %v244_v27, %v287_v29  ;;  %v311_v36 = vmax.f32 %v268_v28, %v295_v30 }
 0x16e   :  { %v250_v39 = vpop.f32.mrb[4].mxu0  ;;  %v274_v40 = vpop.f32.mrb[4].mxu1 }
 0x16f   :  { %v304_v37 = vmax.f32 %v246_v31, %v288_v33  ;;  %v312_v38 = vmax.f32 %v270_v32, %v296_v34  ;;  %319 = vst [vmem:[#allocation2 + $0x10] sm:$0xff] %v303_v35  ;;  %327 = vst [vmem:[#allocation2 + $0x50] sm:$0xff] %v311_v36  ;;  %v289_v41 = vmul.f32 0.2, %v250_v39  ;;  %v297_v42 = vmul.f32 0.2, %v274_v40 }
 0x170   :  { %v252_v43 = vpop.f32.mrb[5].mxu0  ;;  %v276_v44 = vpop.f32.mrb[5].mxu1 }
 0x171   :  { %320 = vst [vmem:[#allocation2 + $0x18] sm:$0xff] %v304_v37  ;;  %328 = vst [vmem:[#allocation2 + $0x58] sm:$0xff] %v312_v38  ;;  %v290_v45 = vmul.f32 0.2, %v252_v43  ;;  %v298_v46 = vmul.f32 0.2, %v276_v44  ;;  %v305_v47 = vmax.f32 %v250_v39, %v289_v41  ;;  %v313_v48 = vmax.f32 %v274_v40, %v297_v42 }
 0x172   :  { %v256_v51 = vpop.f32.mrb[6].mxu0  ;;  %v280_v52 = vpop.f32.mrb[6].mxu1 }
 0x173   :  { %v306_v49 = vmax.f32 %v252_v43, %v290_v45  ;;  %v314_v50 = vmax.f32 %v276_v44, %v298_v46  ;;  %321 = vst [vmem:[#allocation2 + $0x20] sm:$0xff] %v305_v47  ;;  %329 = vst [vmem:[#allocation2 + $0x60] sm:$0xff] %v313_v48  ;;  %v291_v53 = vmul.f32 0.2, %v256_v51  ;;  %v299_v54 = vmul.f32 0.2, %v280_v52 }
 0x174   :  { %v258_v55 = vpop.f32.mrb[7].mxu0  ;;  %v282_v56 = vpop.f32.mrb[7].mxu1 }
 0x175   :  { %322 = vst [vmem:[#allocation2 + $0x28] sm:$0xff] %v306_v49  ;;  %330 = vst [vmem:[#allocation2 + $0x68] sm:$0xff] %v314_v50  ;;  %v292_v57 = vmul.f32 0.2, %v258_v55  ;;  %v300_v58 = vmul.f32 0.2, %v282_v56  ;;  %v307_v59 = vmax.f32 %v256_v51, %v291_v53  ;;  %v315_v60 = vmax.f32 %v280_v52, %v299_v54 }
 0x177   :  { %v308_v61 = vmax.f32 %v258_v55, %v292_v57  ;;  %v316_v62 = vmax.f32 %v282_v56, %v300_v58  ;;  %323 = vst [vmem:[#allocation2 + $0x30] sm:$0xff] %v307_v59  ;;  %331 = vst [vmem:[#allocation2 + $0x70] sm:$0xff] %v315_v60 }
 0x179   :  { %324 = vst [vmem:[#allocation2 + $0x38] sm:$0xff] %v308_v61  ;;  %332 = vst [vmem:[#allocation2 + $0x78] sm:$0xff] %v316_v62 }
 0x17a   :  { %426 = shalt.err (!%p423_p4)
}
 0x17b   :  { %s427_s10 = scalar_lea.hbm %s581_s2, 2048 }
 0x17c   :  { %p428_p5 = scmp.ne.s32.totalorder %s581_s2, %s427_s10  ;;  %p431_p6 = scmp.lt.u32.totalorder %s427_s10, %s581_s2 }
 0x17e   :  { %p433_p7 = pnand %p431_p6, %p428_p5 }
 0x180   :  { %436 = shalt.err (!%p433_p7)
}
 0x181   :  { %s449_s15 = smov 256   ;;  %s450_s0 = smov 16  }
 0x182   :  { %344 = dma.vmem_to_hbm [thread:$0]  %s339_s6, 2048, %s581_s2, [#allocation3], %s449_s15, %s449_s15, %s450_s0  }
 0x183   :  { %437 = dma.done.wait [#allocation3], 2048  }
 0x184   :  { %438 = vsyncadd [#allocation3], 4294965248 }
 0x185   :  { %348 = vsyncpa [#allocation3], 1 }

</bundles_post_ra>
